<compile_context>
chip_gen: v7x
topology: tpu7x:2x2x1
jax: 0.10.0
libtpu: 0.0.40
codegen_flags: <defaults>
</compile_context>

<pallas_src>
import jax
import jax.numpy as jnp
from jax import lax
from jax.experimental import pallas as pl
from jax.experimental.pallas import tpu as pltpu


def _split_kernel(x_ref, sel_e_ref, sel_o_ref, even_ref, odd_ref):
    # x_ref     : [tr, Lt]   row slab; lanes hold interleaved source elements
    # sel_e_ref : [Lt, Le]   0/1 selection matrix (one 1 per column) -> even dests
    # sel_o_ref : [Lt, Lo]   0/1 selection matrix (one 1 per column) -> odd dests
    # even_ref  : [tr, Le],  odd_ref : [tr, Lo]
    x = x_ref[...]
    even_ref[...] = jnp.dot(
        x, sel_e_ref[...], preferred_element_type=jnp.float32,
        precision=lax.Precision.HIGHEST).astype(even_ref.dtype)
    odd_ref[...] = jnp.dot(
        x, sel_o_ref[...], preferred_element_type=jnp.float32,
        precision=lax.Precision.HIGHEST).astype(odd_ref.dtype)


def splitting(x):
    """x: [B, C, N, T] -> (x[..., ::2], x[..., 1::2]), matching DSTIGFN Splitting."""
    B, C, N, T = x.shape
    Te = (T + 1) // 2          # number of even-index time steps
    To = T // 2                # number of odd-index time steps
    He, Ho = N * Te, N * To
    R = B * C
    M = N * T

    if To == 0:                # T in {0, 1}: nothing to de-interleave.
        return x[..., ::2], x[..., 1::2]

    # ---- choose tiling + build the constant selection matrices (trace time) ----
    if T % 2 == 0:
        # Flattened index m = n*T + t is even exactly when t is even, so the
        # de-interleave is a uniform stride-2 pattern over M: tile the lane axis
        # with a fixed chunk and one shared (tiny) selection matrix per chunk.
        lane_tile = M if M <= 256 else 256         # full M, or a multiple of 128
        even_tile = lane_tile // 2
        odd_tile = lane_tile // 2
        u = jnp.arange(lane_tile, dtype=jnp.int32)
        is_even = (u % 2) == 0
        col = u // 2
    else:
        # Odd T: lane parity shifts across n groups; use one full-width selection
        # matrix.  TODO(synk): tile along N for very large N*T with odd T.
        lane_tile = M
        even_tile, odd_tile = He, Ho
        m = jnp.arange(M, dtype=jnp.int32)
        n_idx, t_idx = m // T, m % T
        is_even = (t_idx % 2) == 0
        col = jnp.where(is_even, n_idx * Te + t_idx // 2, n_idx * To + t_idx // 2)

    sel_e = (is_even[:, None]
             & (col[:, None] == jnp.arange(even_tile, dtype=jnp.int32)[None, :])
             ).astype(x.dtype)
    sel_o = ((~is_even)[:, None]
             & (col[:, None] == jnp.arange(odd_tile, dtype=jnp.int32)[None, :])
             ).astype(x.dtype)

    row_tile = R if R <= 512 else 512              # full R, or a multiple of 8
    grid = (pl.cdiv(R, row_tile), pl.cdiv(M, lane_tile))

    # ---- launch -----------------------------------------------------------------
    x_flat = x.reshape(R, M)                       # free reshape, lane-dense
    even_flat, odd_flat = pl.pallas_call(
        _split_kernel,
        out_shape=(jax.ShapeDtypeStruct((R, He), x.dtype),
                   jax.ShapeDtypeStruct((R, Ho), x.dtype)),
        grid=grid,
        in_specs=[
            pl.BlockSpec((row_tile, lane_tile), lambda i, j: (i, j)),
            pl.BlockSpec((lane_tile, even_tile), lambda i, j: (0, 0)),
            pl.BlockSpec((lane_tile, odd_tile), lambda i, j: (0, 0)),
        ],
        out_specs=(
            pl.BlockSpec((row_tile, even_tile), lambda i, j: (i, j)),
            pl.BlockSpec((row_tile, odd_tile), lambda i, j: (i, j)),
        ),
        compiler_params=pltpu.CompilerParams(
            dimension_semantics=("parallel", "parallel")),
    )(x_flat, sel_e, sel_o)

    # Free reshapes back to the PyTorch output shapes.
    return even_flat.reshape(B, C, N, Te), odd_flat.reshape(B, C, N, To)


if __name__ == "__main__":
    key = jax.random.PRNGKey(0)
    B, C, N, T = 2, 4, 16, 16          # batch, channels, nodes, sequence length
    x = jax.random.normal(key, (B, C, N, T), jnp.float32)

    even, odd = splitting(x)
    even, odd = jax.block_until_ready((even, odd))

    # Pure-JAX reference of the PyTorch semantics.
    ref_even = x[:, :, :, ::2]
    ref_odd = x[:, :, :, 1::2]
    assert even.shape == ref_even.shape, (even.shape, ref_even.shape)
    assert odd.shape == ref_odd.shape, (odd.shape, ref_odd.shape)
    assert jnp.allclose(even, ref_even, atol=1e-6), float(jnp.max(jnp.abs(even - ref_even)))
    assert jnp.allclose(odd, ref_odd, atol=1e-6), float(jnp.max(jnp.abs(odd - ref_odd)))

    print("KERNEL_OK")
</pallas_src>

<mosaic_0001>
module attributes {stable_mosaic.version = 11 : i64} {
  func.func @_split_kernel(%arg0: i32, %arg1: i32, %arg2: memref<8x256xf32, #tpu.memory_space<vmem>>, %arg3: memref<256x128xf32, #tpu.memory_space<vmem>>, %arg4: memref<256x128xf32, #tpu.memory_space<vmem>>, %arg5: memref<8x128xf32, #tpu.memory_space<vmem>>, %arg6: memref<8x128xf32, #tpu.memory_space<vmem>>) attributes {dimension_semantics = [#tpu.dimension_semantics<parallel>, #tpu.dimension_semantics<parallel>], iteration_bounds = array<i64: 1, 1>, scalar_prefetch = 0 : i64, scratch_operands = 0 : i64, tpu.core_type = #tpu.core_type<tc>, window_params = [{transform_indices = @transform_0, window_bounds = array<i64: 8, 256>}, {pipeline_mode = #tpu.pipeline_mode<synchronous>, transform_indices = @transform_1, window_bounds = array<i64: 256, 128>}, {pipeline_mode = #tpu.pipeline_mode<synchronous>, transform_indices = @transform_2, window_bounds = array<i64: 256, 128>}, {transform_indices = @transform_3, window_bounds = array<i64: 8, 128>}, {transform_indices = @transform_4, window_bounds = array<i64: 8, 128>}]} {
    %c0 = arith.constant 0 : index
    %c0_0 = arith.constant 0 : index
    %0 = vector.load %arg2[%c0, %c0_0] : memref<8x256xf32, #tpu.memory_space<vmem>>, vector<8x256xf32>
    %c0_1 = arith.constant 0 : index
    %c0_2 = arith.constant 0 : index
    %1 = vector.load %arg3[%c0_1, %c0_2] : memref<256x128xf32, #tpu.memory_space<vmem>>, vector<256x128xf32>
    %cst = arith.constant dense<0.000000e+00> : vector<8x128xf32>
    %2 = tpu.matmul %0, %1, %cst {dimension_numbers = #tpu.dot_dimension_numbers<[1], [0], [0], [1], [0, 0, 1, 1], [], []>, precision = #tpu.contract_precision<fp32>} : vector<8x256xf32>, vector<256x128xf32>, vector<8x128xf32> -> vector<8x128xf32>
    %c0_3 = arith.constant 0 : index
    %c0_4 = arith.constant 0 : index
    %3 = vector.load %arg5[%c0_3, %c0_4] : memref<8x128xf32, #tpu.memory_space<vmem>>, vector<8x128xf32>
    tpu.vector_store %arg5[%c0_3, %c0_4], %2 {strides = array<i32>} : memref<8x128xf32, #tpu.memory_space<vmem>>, vector<8x128xf32>,
    %c0_5 = arith.constant 0 : index
    %c0_6 = arith.constant 0 : index
    %4 = vector.load %arg4[%c0_5, %c0_6] : memref<256x128xf32, #tpu.memory_space<vmem>>, vector<256x128xf32>
    %cst_7 = arith.constant dense<0.000000e+00> : vector<8x128xf32>
    %5 = tpu.matmul %0, %4, %cst_7 {dimension_numbers = #tpu.dot_dimension_numbers<[1], [0], [0], [1], [0, 0, 1, 1], [], []>, precision = #tpu.contract_precision<fp32>} : vector<8x256xf32>, vector<256x128xf32>, vector<8x128xf32> -> vector<8x128xf32>
    %c0_8 = arith.constant 0 : index
    %c0_9 = arith.constant 0 : index
    %6 = vector.load %arg6[%c0_8, %c0_9] : memref<8x128xf32, #tpu.memory_space<vmem>>, vector<8x128xf32>
    tpu.vector_store %arg6[%c0_8, %c0_9], %5 {strides = array<i32>} : memref<8x128xf32, #tpu.memory_space<vmem>>, vector<8x128xf32>,
    return
  }
  func.func @transform_0(%arg0: i32, %arg1: i32) -> (i32, i32) {
    %c0_i32 = arith.constant 0 : i32
    return %arg0, %arg1 : i32, i32
  }
  func.func @transform_1(%arg0: i32, %arg1: i32) -> (i32, i32) {
    %c0_i32 = arith.constant 0 : i32
    %c0_i32_0 = arith.constant 0 : i32
    %c0_i32_1 = arith.constant 0 : i32
    return %c0_i32, %c0_i32_0 : i32, i32
  }
  func.func @transform_2(%arg0: i32, %arg1: i32) -> (i32, i32) {
    %c0_i32 = arith.constant 0 : i32
    %c0_i32_0 = arith.constant 0 : i32
    %c0_i32_1 = arith.constant 0 : i32
    return %c0_i32, %c0_i32_0 : i32, i32
  }
  func.func @transform_3(%arg0: i32, %arg1: i32) -> (i32, i32) {
    %c0_i32 = arith.constant 0 : i32
    return %arg0, %arg1 : i32, i32
  }
  func.func @transform_4(%arg0: i32, %arg1: i32) -> (i32, i32) {
    %c0_i32 = arith.constant 0 : i32
    return %arg0, %arg1 : i32, i32
  }
}

</mosaic_0001>

<bundles_post_ra>
// kernel: tpu_custom_call.1
= control target key start
LH: loop header
LB: loop body
LE: loop exit
PB: predicated region body
PF: predicated region fallthrough
CT: control target
= control target key end

     0   :  { %10 = vsyncpa [#allocation3], 0  ;;  %s3752_s0 = inlined_call_operand.hbm [shape: f32[8,256], index: 0, kind: input, shape index: {}]   ;;  %s3753_s1 = inlined_call_operand.hbm [shape: f32[256,128], index: 1, kind: input, shape index: {}]   ;;  %s3754_s2 = inlined_call_operand.hbm [shape: f32[256,128], index: 2, kind: input, shape index: {}]   ;;  %s3755_s3 = inlined_call_operand.hbm [shape: f32[8,128], index: 3, kind: output, shape index: {0}]   ;;  %s3756_s4 = inlined_call_operand.hbm [shape: f32[8,128], index: 4, kind: output, shape index: {1}]  }
   0x1   :  { %11 = vsyncpa [#allocation6], 0 }
   0x2   :  { %12 = vsyncpa [#allocation4], 0 }
   0x3   :  { %13 = vsyncpa [#allocation10], 0  ;;  %s2808_s15 = smov [#allocation5]   ;;  %s2690_s19 = scalar_lea.hbm %s3753_s1, 4096 }
   0x4   :  { %s29_s16 = sshll.u32 %s2808_s15, 4  ;;  %p2691_p0 = scmp.ne.s32.totalorder %s3753_s1, %s2690_s19  ;;  %s30_s16 = int_to_ptr.vmem [resolvable:$true] %s29_s16 }
   0x5   :  { %p2694_p1 = scmp.lt.u32.totalorder %s2690_s19, %s3753_s1 }
   0x7   :  { %p2696_p2 = pnand %p2694_p1, %p2691_p0 }
   0x9   :  { %2699 = shalt.err (!%p2696_p2)
}
   0xa   :  { %s2700_s24 = scalar_lea.vmem %s30_s16, 4096  ;;  %p2705_p4 = scmp.lt.s32.totalorder %s30_s16, %s30_s16 }
   0xb   :  { %p2701_p3 = scmp.ne.s32.totalorder %s30_s16, %s2700_s24  ;;  %p2706_p5 = scmp.lt.s32.totalorder %s2700_s24, %s2700_s24 }
   0xd   :  { %p2707_p6 = por %p2706_p5, %p2705_p4 }
   0xf   :  { %p2708_p7 = pnand %p2707_p6, %p2701_p3 }
  0x11   :  { %2711 = shalt.err (!%p2708_p7)
}
  0x12   :  { %s2809_s25 = smov 128   ;;  %s2810_s26 = smov 8  }
  0x13   :  { %35 = dma.hbm_to_vmem [thread:$0]  %s3753_s1, 4096, %s30_s16, [#allocation6], %s2809_s25, %s2809_s25, %s2810_s26  }
  0x14   :  { %s2811_s29 = smov [#allocation2]   ;;  %s2812_s5 = smov [#allocation7]  }
  0x15   :  { %s20_s30 = sshll.u32 %s2811_s29, 4  ;;  %s41_s6 = sshll.u32 %s2812_s5, 4  ;;  %s21_s30 = int_to_ptr.vmem [resolvable:$true] %s20_s30  ;;  %s42_s6 = int_to_ptr.vmem [resolvable:$true] %s41_s6 }
  0x16   :  { %s2712_s9 = scalar_lea.hbm %s3752_s0, 256 }
  0x17   :  { %p2713_p8 = scmp.ne.s32.totalorder %s3752_s0, %s2712_s9  ;;  %p2716_p9 = scmp.lt.u32.totalorder %s2712_s9, %s3752_s0 }
  0x19   :  { %p2718_p10 = pnand %p2716_p9, %p2713_p8 }
  0x1b   :  { %2721 = shalt.err (!%p2718_p10)
}
  0x1c   :  { %s2722_s1 = scalar_lea.vmem %s21_s30, 256  ;;  %p2727_p12 = scmp.lt.s32.totalorder %s21_s30, %s21_s30 }
  0x1d   :  { %p2723_p11 = scmp.ne.s32.totalorder %s21_s30, %s2722_s1  ;;  %p2728_p13 = scmp.lt.s32.totalorder %s2722_s1, %s2722_s1 }
  0x1f   :  { %p2729_p0 = por %p2728_p13, %p2727_p12 }
  0x21   :  { %p2730_p1 = pnand %p2729_p0, %p2723_p11 }
  0x23   :  { %2733 = shalt.err (!%p2730_p1)
}
  0x24   :  { %23 = dma.hbm_to_vmem [thread:$0]  %s3752_s0, 256, %s21_s30, [#allocation3]  }
  0x25   :  { %s2734_s18 = scalar_lea.hbm %s3754_s2, 4096 }
  0x26   :  { %p2735_p2 = scmp.ne.s32.totalorder %s3754_s2, %s2734_s18  ;;  %p2738_p3 = scmp.lt.u32.totalorder %s2734_s18, %s3754_s2 }
  0x28   :  { %p2740_p4 = pnand %p2738_p3, %p2735_p2 }
  0x2a   :  { %2743 = shalt.err (!%p2740_p4)
}
  0x2b   :  { %s2744_s23 = scalar_lea.vmem %s42_s6, 4096  ;;  %p2749_p6 = scmp.lt.s32.totalorder %s42_s6, %s42_s6 }
  0x2c   :  { %p2745_p5 = scmp.ne.s32.totalorder %s42_s6, %s2744_s23  ;;  %p2750_p7 = scmp.lt.s32.totalorder %s2744_s23, %s2744_s23 }
  0x2e   :  { %p2751_p8 = por %p2750_p7, %p2749_p6 }
  0x30   :  { %p2752_p9 = pnand %p2751_p8, %p2745_p5 }
  0x32   :  { %2755 = shalt.err (!%p2752_p9)
}
  0x33   :  { %47 = dma.hbm_to_vmem [thread:$0]  %s3754_s2, 4096, %s42_s6, [#allocation6], %s2809_s25, %s2809_s25, %s2810_s26  }
  0x34   :  { %2800 = dma.done.wait [#allocation3], 256  }
  0x35   :  { %2801 = vsyncadd [#allocation3], 4294967040 }
  0x36   :  { %2802 = dma.done.wait [#allocation6], 8192  }
  0x37   :  { %2803 = vsyncadd [#allocation6], 4294959104  ;;  %v75_v0 = vld [vmem:[#allocation5 + $0x80] sm:$0xff]  ;;  %v76_v1 = vld [vmem:[#allocation5 + $0x88] sm:$0xff]  ;;  %s2813_s2 = smov [#allocation8]  }
  0x38   :  { %v59_v2 = vld [vmem:[#allocation5] sm:$0xff]  ;;  %v140_v3 = vand.u32 4294901760, %v75_v0  ;;  %v143_v4 = vand.u32 4294901760, %v76_v1  ;;  %v60_v5 = vld [vmem:[#allocation5 + $0x8] sm:$0xff]  ;;  %v77_v7 = vld [vmem:[#allocation5 + $0x90] sm:$0xff]  ;;  %s1855_s25 = sshll.u32 %s2813_s2, 4  ;;  %s1856_s25 = int_to_ptr.vmem [resolvable:$true] %s1855_s25 }
  0x39   :  { %v92_v6 = vand.u32 4294901760, %v59_v2  ;;  %v78_v8 = vld [vmem:[#allocation5 + $0x98] sm:$0xff]  ;;  %v95_v9 = vand.u32 4294901760, %v60_v5  ;;  %v146_v10 = vand.u32 4294901760, %v77_v7  ;;  %v61_v12 = vld [vmem:[#allocation5 + $0x10] sm:$0xff]  ;;  %v79_v18 = vld [vmem:[#allocation5 + $0xa0] sm:$0xff]  ;;  %p2761_p11 = scmp.lt.s32.totalorder %s1856_s25, %s1856_s25 }
  0x3a   :  { %v149_v11 = vand.u32 4294901760, %v78_v8  ;;  %v62_v13 = vld [vmem:[#allocation5 + $0x18] sm:$0xff]  ;;  %v2882_v14 = vpack.c.bf16 %v143_v4, %v140_v3  ;;  %v98_v16 = vand.u32 4294901760, %v61_v12  ;;  %v80_v19 = vld [vmem:[#allocation5 + $0xa8] sm:$0xff]  ;;  %v63_v23 = vld [vmem:[#allocation5 + $0x20] sm:$0xff]  ;;  %v152_v29 = vand.u32 4294901760, %v79_v18 }
  0x3b   :  { %v2884_v15 = vsub.f32 %v59_v2, %v92_v6  ;;  %v101_v17 = vand.u32 4294901760, %v62_v13  ;;  %v2886_v20 = vpack.c.bf16 %v95_v9, %v92_v6  ;;  %v2888_v21 = vsub.f32 %v60_v5, %v95_v9  ;;  %v64_v24 = vld [vmem:[#allocation5 + $0x28] sm:$0xff]  ;;  %v81_v37 = vld [vmem:[#allocation5 + $0xb0] sm:$0xff]  ;;  %v82_v42 = vld [vmem:[#allocation5 + $0xb8] sm:$0xff]  ;;  %s2756_s26 = scalar_lea.vmem %s1856_s25, 128 }
  0x3c   :  { %v2890_v22 = vpack.c.bf16 %v149_v11, %v146_v10  ;;  %2300 = vmatprep.subr.bf16.mxu0 %v2882_v14  ;;  %v2893_v25 = vsub.f32 %v77_v7, %v146_v10  ;;  %v2895_v26 = vsub.f32 %v78_v8, %v149_v11  ;;  %v2899_v28 = vsub.f32 %v61_v12, %v98_v16  ;;  %v65_v55 = vld [vmem:[#allocation5 + $0x30] sm:$0xff]  ;;  %v66_v56 = vld [vmem:[#allocation5 + $0x38] sm:$0xff]  ;;  %v83_v5 = vld [vmem:[#allocation5 + $0xc0] sm:$0xff]  ;;  %p2757_p10 = scmp.ne.s32.totalorder %s1856_s25, %s2756_s26  ;;  %p2762_p12 = scmp.lt.s32.totalorder %s2756_s26, %s2756_s26 }
  0x3d   :  { %v2897_v27 = vpack.c.bf16 %v101_v17, %v98_v16  ;;  %2302 = vmatpush3.bf16.msra.mxu0 %v2886_v20  ;;  %v155_v30 = vand.u32 4294901760, %v80_v19  ;;  %v2902_v31 = vsub.f32 %v75_v0, %v140_v3  ;;  %v2904_v32 = vsub.f32 %v76_v1, %v143_v4  ;;  %v84_v6 = vld [vmem:[#allocation5 + $0xc8] sm:$0xff]  ;;  %v67_v11 = vld [vmem:[#allocation5 + $0x40] sm:$0xff] }
  0x3e   :  { %2304 = vmatprep.subr.bf16.mxu0 %v2890_v22  ;;  %v104_v33 = vand.u32 4294901760, %v63_v23  ;;  %v107_v34 = vand.u32 4294901760, %v64_v24  ;;  %v3772_v35 = vand.u32 4294901760, %v2884_v15  ;;  %v3771_v36 = vand.u32 4294901760, %v2888_v21  ;;  %p2763_p13 = por %p2762_p12, %p2761_p11 }
  0x3f   :  { %v2909_v38 = vsub.f32 %v62_v13, %v101_v17  ;;  %v2911_v39 = vpack.c.bf16 %v155_v30, %v152_v29  ;;  %v2913_v40 = vsub.f32 %v79_v18, %v152_v29  ;;  %v3776_v41 = vand.u32 4294901760, %v2902_v31  ;;  %v68_v29 = vld [vmem:[#allocation5 + $0x48] sm:$0xff] }
  0x40   :  { %v2916_v43 = vsub.f32 %v80_v19, %v155_v30  ;;  %v3774_v44 = vand.u32 4294901760, %v2904_v32  ;;  %v2919_v45 = vpack.c.bf16 %v107_v34, %v104_v33  ;;  %v2921_v46 = vsub.f32 %v63_v23, %v104_v33  ;;  %p2764_p0 = pnand %p2763_p13, %p2757_p10 }
  0x41   :  { %2306 = vmatpush3.bf16.msra.mxu0 %v2897_v27  ;;  %v319_v47 = vsub.f32 %v2902_v31, %v3776_v41  ;;  %v207_v48 = vsub.f32 %v2884_v15, %v3772_v35  ;;  %v214_v49 = vsub.f32 %v2888_v21, %v3771_v36  ;;  %v158_v50 = vand.u32 4294901760, %v81_v37  ;;  %v58_v41 = vld [vmem:[#allocation2 + $0x8] sm:$0xff] }
  0x42   :  { %2308 = vmatprep.subr.bf16.mxu0 %v2911_v39  ;;  %v326_v51 = vsub.f32 %v2904_v32, %v3774_v44  ;;  %v161_v52 = vand.u32 4294901760, %v82_v42  ;;  %v3769_v53 = vand.u32 4294901760, %v2893_v25  ;;  %v3767_v54 = vand.u32 4294901760, %v2895_v26 }
  0x43   :  { %v320_v57 = vand.u32 4294901760, %v319_v47  ;;  %v2939_v58 = vsub.f32 %v64_v24, %v107_v34  ;;  %v208_v59 = vand.u32 4294901760, %v207_v48  ;;  %v215_v60 = vand.u32 4294901760, %v214_v49 }
  0x44   :  { %v327_v61 = vand.u32 4294901760, %v326_v51  ;;  %v2941_v62 = vpack.c.bf16 %v161_v52, %v158_v50  ;;  %v2943_v63 = vsub.f32 %v81_v37, %v158_v50  ;;  %v333_v0 = vsub.f32 %v2893_v25, %v3769_v53 }
  0x45   :  { %2310 = vmatpush3.bf16.msra.mxu0 %v2919_v45  ;;  %v2333_v1 = vpack.c.bf16 %v215_v60, %v208_v59  ;;  %v340_v2 = vsub.f32 %v2895_v26, %v3767_v54  ;;  %v110_v3 = vand.u32 4294901760, %v65_v55  ;;  %v113_v4 = vand.u32 4294901760, %v66_v56  ;;  %v86_v59 = vld [vmem:[#allocation5 + $0xd8] sm:$0xff] }
  0x46   :  { %v2331_v7 = vpack.c.bf16 %v327_v61, %v320_v57  ;;  %2312 = vmatprep.subr.bf16.mxu0 %v2941_v62  ;;  %v334_v8 = vand.u32 4294901760, %v333_v0  ;;  %v3766_v9 = vand.u32 4294901760, %v2899_v28  ;;  %v3764_v10 = vand.u32 4294901760, %v2909_v38  ;;  %v85_v57 = vld [vmem:[#allocation5 + $0xd0] sm:$0xff]  ;;  %v90_v54 = vld [vmem:[#allocation5 + $0xf8] sm:$0xff] }
  0x47   :  { %v2955_v12 = vsub.f32 %v82_v42, %v161_v52  ;;  %v341_v13 = vand.u32 4294901760, %v340_v2  ;;  %v2957_v16 = vpack.c.bf16 %v113_v4, %v110_v3  ;;  %v2959_v17 = vsub.f32 %v65_v55, %v110_v3 }
  0x48   :  { %2332 = vmatprep.subr.bf16.mxu1 %v2331_v7  ;;  %v221_v18 = vsub.f32 %v2899_v28, %v3766_v9  ;;  %v228_v19 = vsub.f32 %v2909_v38, %v3764_v10  ;;  %v164_v23 = vand.u32 4294901760, %v83_v5  ;;  %v167_v24 = vand.u32 4294901760, %v84_v6  ;;  %v89_v9 = vld [vmem:[#allocation5 + $0xf0] sm:$0xff] }
  0x49   :  { %2334 = vmatpush3.bf16.msra.mxu1 %v2333_v1  ;;  %v2335_v30 = vpack.c.bf16 %v341_v13, %v334_v8  ;;  %2314 = vmatpush3.bf16.msra.mxu0 %v2957_v16  ;;  %v3762_v33 = vand.u32 4294901760, %v2913_v40  ;;  %v3761_v34 = vand.u32 4294901760, %v2916_v43  ;;  %v116_v37 = vand.u32 4294901760, %v67_v11  ;;  %v69_v1 = vld [vmem:[#allocation5 + $0x50] sm:$0xff] }
  0x4a   :  { %v2970_v42 = vsub.f32 %v66_v56, %v113_v4  ;;  %v222_v47 = vand.u32 4294901760, %v221_v18  ;;  %v229_v48 = vand.u32 4294901760, %v228_v19  ;;  %v2972_v49 = vpack.c.bf16 %v167_v24, %v164_v23  ;;  %v70_v18 = vld [vmem:[#allocation5 + $0x58] sm:$0xff] }
  0x4b   :  { %2336 = vmatprep.subr.bf16.mxu1 %v2335_v30  ;;  %v2974_v50 = vsub.f32 %v83_v5, %v164_v23  ;;  %v347_v51 = vsub.f32 %v2913_v40, %v3762_v33  ;;  %v354_v52 = vsub.f32 %v2916_v43, %v3761_v34  ;;  %v119_v55 = vand.u32 4294901760, %v68_v29 }
  0x4c   :  { %v2337_v56 = vpack.c.bf16 %v229_v48, %v222_v47  ;;  %2316 = vmatprep.subr.bf16.mxu0 %v2972_v49  ;;  %v2983_v60 = vsub.f32 %v84_v6, %v167_v24  ;;  %v3759_v61 = vand.u32 4294901760, %v2921_v46  ;;  %v3757_v0 = vand.u32 4294901760, %v2939_v58 }
  0x4d   :  { %v348_v2 = vand.u32 4294901760, %v347_v51  ;;  %v355_v3 = vand.u32 4294901760, %v354_v52  ;;  %v2987_v4 = vpack.c.bf16 %v119_v55, %v116_v37  ;;  %v2989_v5 = vsub.f32 %v67_v11, %v116_v37 }
  0x4e   :  { %2338 = vmatpush3.bf16.msra.mxu1 %v2337_v56  ;;  %v235_v7 = vsub.f32 %v2921_v46, %v3759_v61  ;;  %v242_v6 = vsub.f32 %v2939_v58, %v3757_v0  ;;  %v170_v8 = vand.u32 4294901760, %v85_v57  ;;  %v173_v13 = vand.u32 4294901760, %v86_v59  ;;  %v88_v0 = vld [vmem:[#allocation5 + $0xe8] sm:$0xff] }
  0x4f   :  { %v2339_v19 = vpack.c.bf16 %v355_v3, %v348_v2  ;;  %2318 = vmatpush3.bf16.msra.mxu0 %v2987_v4  ;;  %v3758_v23 = vand.u32 4294901760, %v2943_v63  ;;  %v3760_v11 = vand.u32 4294901760, %v2955_v12  ;;  %v122_v24 = vand.u32 4294901760, %v69_v1  ;;  %v87_v3 = vld [vmem:[#allocation5 + $0xe0] sm:$0xff] }
  0x50   :  { %v3000_v30 = vsub.f32 %v68_v29, %v119_v55  ;;  %v236_v37 = vand.u32 4294901760, %v235_v7  ;;  %v243_v47 = vand.u32 4294901760, %v242_v6  ;;  %v3002_v48 = vpack.c.bf16 %v173_v13, %v170_v8  ;;  %v71_v6 = vld [vmem:[#allocation5 + $0x60] sm:$0xff] }
  0x51   :  { %2340 = vmatprep.subr.bf16.mxu1 %v2339_v19  ;;  %v3004_v51 = vsub.f32 %v85_v57, %v170_v8  ;;  %v361_v52 = vsub.f32 %v2943_v63, %v3758_v23  ;;  %v368_v56 = vsub.f32 %v2955_v12, %v3760_v11  ;;  %v125_v2 = vand.u32 4294901760, %v70_v18  ;;  %v72_v11 = vld [vmem:[#allocation5 + $0x68] sm:$0xff] }
  0x52   :  { %3848 = vst [vmem:[#allocation15_spill] sm:$0xff] %v3002_v48  ;;  %v2341_v29 = vpack.c.bf16 %v243_v47, %v236_v37  ;;  %2320 = vmatprep.subr.bf16.mxu0 %v3002_v48  ;;  %v3013_v55 = vsub.f32 %v86_v59, %v173_v13  ;;  %v3763_v7 = vand.u32 4294901760, %v2959_v17  ;;  %v3765_v57 = vand.u32 4294901760, %v2970_v42 }
  0x53   :  { %v362_v8 = vand.u32 4294901760, %v361_v52  ;;  %v369_v19 = vand.u32 4294901760, %v368_v56  ;;  %v3017_v23 = vpack.c.bf16 %v125_v2, %v122_v24  ;;  %v3019_v61 = vsub.f32 %v69_v1, %v122_v24 }
  0x54   :  { %2342 = vmatpush3.bf16.msra.mxu1 %v2341_v29  ;;  %v249_v37 = vsub.f32 %v2959_v17, %v3763_v7  ;;  %v256_v59 = vsub.f32 %v2970_v42, %v3765_v57  ;;  %v176_v13 = vand.u32 4294901760, %v87_v3  ;;  %v179_v47 = vand.u32 4294901760, %v88_v0 }
  0x55   :  { %3849 = vst [vmem:[#allocation16_spill] sm:$0xff] %v3017_v23  ;;  %v2343_v34 = vpack.c.bf16 %v369_v19, %v362_v8  ;;  %2322 = vmatpush3.bf16.msra.mxu0 %v3017_v23  ;;  %v3768_v52 = vand.u32 4294901760, %v2974_v50  ;;  %v3770_v1 = vand.u32 4294901760, %v2983_v60  ;;  %v128_v24 = vand.u32 4294901760, %v71_v6 }
  0x56   :  { %v3030_v56 = vsub.f32 %v70_v18, %v125_v2  ;;  %v250_v29 = vand.u32 4294901760, %v249_v37  ;;  %v257_v33 = vand.u32 4294901760, %v256_v59  ;;  %v3032_v7 = vpack.c.bf16 %v179_v47, %v176_v13  ;;  %v73_v37 = vld [vmem:[#allocation5 + $0x70] sm:$0xff] }
  0x57   :  { %2344 = vmatprep.subr.bf16.mxu1 %v2343_v34  ;;  %v3034_v10 = vsub.f32 %v87_v3, %v176_v13  ;;  %v375_v8 = vsub.f32 %v2974_v50, %v3768_v52  ;;  %v382_v19 = vsub.f32 %v2983_v60, %v3770_v1  ;;  %v131_v57 = vand.u32 4294901760, %v72_v11  ;;  %v74_v1 = vld [vmem:[#allocation5 + $0x78] sm:$0xff] }
  0x58   :  { %3850 = vst [vmem:[#allocation17_spill] sm:$0xff] %v3032_v7  ;;  %v2345_v18 = vpack.c.bf16 %v257_v33, %v250_v29  ;;  %2324 = vmatprep.subr.bf16.mxu0 %v3032_v7  ;;  %v3043_v2 = vsub.f32 %v88_v0, %v179_v47  ;;  %v3773_v34 = vand.u32 4294901760, %v2989_v5  ;;  %v3775_v3 = vand.u32 4294901760, %v3000_v30 }
  0x59   :  { %v376_v59 = vand.u32 4294901760, %v375_v8  ;;  %v383_v13 = vand.u32 4294901760, %v382_v19  ;;  %v3047_v52 = vpack.c.bf16 %v131_v57, %v128_v24  ;;  %v3049_v53 = vsub.f32 %v71_v6, %v128_v24 }
  0x5a   :  { %2346 = vmatpush3.bf16.msra.mxu1 %v2345_v18  ;;  %v263_v33 = vsub.f32 %v2989_v5, %v3773_v34  ;;  %v270_v0 = vsub.f32 %v3000_v30, %v3775_v3  ;;  %v182_v47 = vand.u32 4294901760, %v89_v9  ;;  %v185_v29 = vand.u32 4294901760, %v90_v54 }
  0x5b   :  { %3851 = vst [vmem:[#allocation18_spill] sm:$0xff] %v3047_v52  ;;  %v2347_v36 = vpack.c.bf16 %v383_v13, %v376_v59  ;;  %2326 = vmatpush3.bf16.msra.mxu0 %v3047_v52  ;;  %v3779_v8 = vand.u32 4294901760, %v3004_v51  ;;  %v3780_v6 = vand.u32 4294901760, %v3013_v55  ;;  %v134_v24 = vand.u32 4294901760, %v73_v37 }
  0x5c   :  { %v3060_v19 = vsub.f32 %v72_v11, %v131_v57  ;;  %v264_v18 = vand.u32 4294901760, %v263_v33  ;;  %v271_v35 = vand.u32 4294901760, %v270_v0  ;;  %v3062_v34 = vpack.c.bf16 %v185_v29, %v182_v47 }
  0x5d   :  { %2348 = vmatprep.subr.bf16.mxu1 %v2347_v36  ;;  %v3064_v44 = vsub.f32 %v89_v9, %v182_v47  ;;  %v389_v59 = vsub.f32 %v3004_v51, %v3779_v8  ;;  %v396_v13 = vsub.f32 %v3013_v55, %v3780_v6  ;;  %v137_v3 = vand.u32 4294901760, %v74_v1  ;;  %v57_v9 = vld [vmem:[#allocation2] sm:$0xff] }
  0x5e   :  { %3852 = vst [vmem:[#allocation19_spill] sm:$0xff] %v3062_v34  ;;  %v2349_v52 = vpack.c.bf16 %v271_v35, %v264_v18  ;;  %2328 = vmatprep.subr.bf16.mxu0 %v3062_v34  ;;  %v3073_v11 = vsub.f32 %v90_v54, %v185_v29  ;;  %v3781_v57 = vand.u32 4294901760, %v3019_v61  ;;  %v3782_v36 = vand.u32 4294901760, %v3030_v56 }
  0x5f   :  { %v390_v33 = vand.u32 4294901760, %v389_v59  ;;  %v397_v0 = vand.u32 4294901760, %v396_v13  ;;  %v3077_v47 = vpack.c.bf16 %v137_v3, %v134_v24  ;;  %v3079_v8 = vsub.f32 %v73_v37, %v134_v24 }
  0x60   :  { %2350 = vmatpush3.bf16.msra.mxu1 %v2349_v52  ;;  %v277_v35 = vsub.f32 %v3019_v61, %v3781_v57  ;;  %v284_v54 = vsub.f32 %v3030_v56, %v3782_v36  ;;  %v3087_v29 = vand.u32 4294901760, %v58_v41  ;;  %v3785_v18 = vand.u32 4294901760, %v3034_v10 }
  0x61   :  { %3853 = vst [vmem:[#allocation20_spill] sm:$0xff] %v3077_v47  ;;  %v2351_v6 = vpack.c.bf16 %v397_v0, %v390_v33  ;;  %2330 = vmatpush3.bf16.msra.mxu0 %v3077_v47  ;;  %v3791_v59 = vand.u32 4294901760, %v3043_v2  ;;  %v2363_v52 = vpack.c.bf16 %v2904_v32, %v2902_v31  ;;  %v3094_v37 = vand.u32 4294901760, %v57_v9 }
  0x62   :  { %3854 = vst [vmem:[#allocation21_spill] sm:$0xff] %v3087_v29  ;;  %v278_v24 = vand.u32 4294901760, %v277_v35  ;;  %v285_v13 = vand.u32 4294901760, %v284_v54  ;;  %v3097_v57 = vsub.f32 %v58_v41, %v3087_v29  ;;  %v403_v36 = vsub.f32 %v3034_v10, %v3785_v18  ;;  %428 = vmatprep.mubr.f32.mxu1 %v3087_v29 }
  0x63   :  { %2352 = vmatprep.subr.bf16.mxu1 %v2351_v6  ;;  %v410_v33 = vsub.f32 %v3043_v2, %v3791_v59  ;;  %2364 = vmatprep.subr.bf16.mxu0 %v2363_v52  ;;  %v3107_v0 = vsub.f32 %v57_v9, %v3094_v37  ;;  %v3790_v35 = vand.u32 4294901760, %v3049_v53  ;;  %v3794_v41 = vand.u32 4294901760, %v3060_v19 }
  0x64   :  { %3855 = vst [vmem:[#allocation22_spill] sm:$0xff] %v3097_v57  ;;  %v3111_v54 = vsub.f32 %v74_v1, %v137_v3  ;;  %v2353_v47 = vpack.c.bf16 %v285_v13, %v278_v24  ;;  %v3114_v18 = vand.u32 4294901760, %v3097_v57  ;;  %v404_v34 = vand.u32 4294901760, %v403_v36 }
  0x65   :  { %3856 = vst [vmem:[#allocation23_spill] sm:$0xff] %v3107_v0  ;;  %v411_v6 = vand.u32 4294901760, %v410_v33  ;;  %v3117_v29 = vand.u32 4294901760, %v3107_v0  ;;  %v291_v9 = vsub.f32 %v3049_v53, %v3790_v35  ;;  %v298_v52 = vsub.f32 %v3060_v19, %v3794_v41 }
  0x66   :  { %3857 = vst [vmem:[#allocation24_spill] sm:$0xff] %v3114_v18  ;;  %2354 = vmatpush3.bf16.msra.mxu1 %v2353_v47  ;;  %v190_v1 = vsub.f32 %v3097_v57, %v3114_v18  ;;  %v2365_v3 = vpack.c.bf16 %v2888_v21, %v2884_v15  ;;  %v3799_v36 = vand.u32 4294901760, %v3064_v44  ;;  %v3802_v24 = vand.u32 4294901760, %v3073_v11 }
  0x67   :  { %3858 = vst [vmem:[#allocation25_spill] sm:$0xff] %v3117_v29  ;;  %v2355_v13 = vpack.c.bf16 %v411_v6, %v404_v34  ;;  %v196_v33 = vsub.f32 %v3107_v0, %v3117_v29  ;;  %v292_v35 = vand.u32 4294901760, %v291_v9  ;;  %v299_v59 = vand.u32 4294901760, %v298_v52 }
  0x68   :  { %v3133_v7 = vand.u32 4294901760, %v190_v1  ;;  %v417_v47 = vsub.f32 %v3064_v44, %v3799_v36  ;;  %v424_v41 = vsub.f32 %v3073_v11, %v3802_v24  ;;  %v3801_v23 = vand.u32 4294901760, %v3079_v8 }
  0x69   :  { %2356 = vmatprep.subr.bf16.mxu1 %v2355_v13  ;;  %v3142_v48 = vand.u32 4294901760, %v196_v33  ;;  %v2357_v34 = vpack.c.bf16 %v299_v59, %v292_v35  ;;  %v2367_v6 = vpack.c.bf16 %v2895_v26, %v2893_v25  ;;  %v3800_v9 = vand.u32 4294901760, %v3111_v54 }
  0x6a   :  { %192 = vmatprep.mubr.f32.mxu0 %v3133_v7  ;;  %v418_v52 = vand.u32 4294901760, %v417_v47  ;;  %v425_v1 = vand.u32 4294901760, %v424_v41  ;;  %v305_v36 = vsub.f32 %v3079_v8, %v3801_v23  ;;  %v2369_v33 = vpack.c.bf16 %v2909_v38, %v2899_v28 }
  0x6b   :  { %3859 = vst [vmem:[#allocation26_spill] sm:$0xff] %v3142_v48  ;;  %198 = vmatmul.mubr.f32.vlgmr.msra.gmra.mrb[0].mxu0 %v3142_v48  ;;  %2358 = vmatpush3.bf16.msra.mxu1 %v2357_v34  ;;  %v312_v59 = vsub.f32 %v3111_v54, %v3800_v9  ;;  %v2371_v47 = vpack.c.bf16 %v2916_v43, %v2913_v40  ;;  %v3862_v23 = vand.u32 4294901760, %v2884_v15  ;;  %v3864_v24 = vand.u32 4294901760, %v2893_v25 }
  0x6c   :  { %2366 = vmatpush3.bf16.msra.mxu0 %v2365_v3  ;;  %v2359_v35 = vpack.c.bf16 %v425_v1, %v418_v52  ;;  %v306_v13 = vand.u32 4294901760, %v305_v36  ;;  %565 = vmatprep.mubr.f32.mxu0 %v3097_v57  ;;  %v2373_v34 = vpack.c.bf16 %v2939_v58, %v2921_v46  ;;  %v2375_v9 = vpack.c.bf16 %v2955_v12, %v2943_v63 }
  0x6d   :  { %2368 = vmatprep.subr.bf16.mxu0 %v2367_v6  ;;  %v313_v41 = vand.u32 4294901760, %v312_v59  ;;  %v3860_v36 = vand.u32 4294901760, %v2902_v31  ;;  %v3861_v52 = vand.u32 4294901760, %v2904_v32  ;;  %v3863_v6 = vand.u32 4294901760, %v2888_v21 }
  0x6e   :  { %2360 = vmatprep.subr.bf16.mxu1 %v2359_v35  ;;  %v3865_v35 = vand.u32 4294901760, %v2895_v26  ;;  %v3866_v48 = vand.u32 4294901760, %v2899_v28  ;;  %v3868_v31 = vand.u32 4294901760, %v2913_v40  ;;  %v3869_v32 = vand.u32 4294901760, %v2916_v43 }
  0x6f   :  { %v2361_v3 = vpack.c.bf16 %v313_v41, %v306_v13  ;;  %v2427_v1 = vpack.c.bf16 %v3861_v52, %v3860_v36  ;;  %v2429_v59 = vpack.c.bf16 %v3863_v6, %v3862_v23  ;;  %v3867_v13 = vand.u32 4294901760, %v2909_v38  ;;  %v3882_v52 = vld [vmem:[#allocation17_spill] sm:$0xff] }
  0x70   :  { %v2431_v57 = vpack.c.bf16 %v3865_v35, %v3864_v24  ;;  %2370 = vmatpush3.bf16.msra.mxu0 %v2369_v33  ;;  %v2435_v36 = vpack.c.bf16 %v3869_v32, %v3868_v31  ;;  %v3870_v15 = vand.u32 4294901760, %v2921_v46  ;;  %v3871_v21 = vand.u32 4294901760, %v2939_v58  ;;  %v3883_v6 = vld [vmem:[#allocation21_spill] sm:$0xff]  ;;  %v3884_v31 = vld [vmem:[#allocation18_spill] sm:$0xff] }
  0x71   :  { %v2433_v41 = vpack.c.bf16 %v3867_v13, %v3866_v48  ;;  %v3872_v25 = vand.u32 4294901760, %v2943_v63  ;;  %v3873_v26 = vand.u32 4294901760, %v2955_v12  ;;  %2362 = vmatpush3.bf16.msra.mxu1 %v2361_v3  ;;  %2372 = vmatprep.subr.bf16.mxu0 %v2371_v47  ;;  %v3874_v28 = vand.u32 4294901760, %v2959_v17  ;;  %v970_v35 = vld [vmem:[#allocation7 + $0x80] sm:$0xff]  ;;  %v971_v13 = vld [vmem:[#allocation7 + $0x88] sm:$0xff] }
  0x72   :  { %v3188_v23 = vpack.c.bf16 %v3871_v21, %v3870_v15  ;;  %v3875_v38 = vand.u32 4294901760, %v2970_v42  ;;  %v3876_v43 = vand.u32 4294901760, %v2974_v50  ;;  %v3877_v46 = vand.u32 4294901760, %v2983_v60  ;;  %2396 = vmatprep.subr.bf16.mxu1 %v2882_v14  ;;  %v954_v32 = vld [vmem:[#allocation7] sm:$0xff]  ;;  %v955_v15 = vld [vmem:[#allocation7 + $0x8] sm:$0xff]  ;;  %v3885_v21 = vld [vmem:[#allocation19_spill] sm:$0xff] }
  0x73   :  { %v3194_v24 = vpack.c.bf16 %v3873_v26, %v3872_v25  ;;  %v3878_v63 = vand.u32 4294901760, %v2989_v5  ;;  %v3879_v12 = vand.u32 4294901760, %v3000_v30  ;;  %v2377_v33 = vpack.c.bf16 %v2970_v42, %v2959_v17 }
  0x74   :  { %v3200_v40 = vpack.c.bf16 %v3875_v38, %v3874_v28  ;;  %v3206_v58 = vpack.c.bf16 %v3877_v46, %v3876_v43  ;;  %430 = vmatmul.mubr.f32.vlgmr.msra.gmra.mrb[0].mxu1 %v3094_v37  ;;  %2374 = vmatpush3.bf16.msra.mxu0 %v2373_v34  ;;  %v2379_v47 = vpack.c.bf16 %v2983_v60, %v2974_v50  ;;  %v3881_v34 = vld [vmem:[#allocation16_spill] sm:$0xff]  ;;  %v1035_v25 = vand.u32 4294901760, %v970_v35 }
  0x75   :  { %v3212_v48 = vpack.c.bf16 %v3879_v12, %v3878_v63  ;;  %2398 = vmatpush3.bf16.msra.mxu1 %v2886_v20  ;;  %2376 = vmatprep.subr.bf16.mxu0 %v2375_v9  ;;  %v2381_v3 = vpack.c.bf16 %v3000_v30, %v2989_v5  ;;  %v2383_v17 = vpack.c.bf16 %v3013_v55, %v3004_v51  ;;  %v3880_v9 = vld [vmem:[#allocation15_spill] sm:$0xff]  ;;  %v1038_v26 = vand.u32 4294901760, %v971_v13  ;;  %v3886_v38 = vld [vmem:[#allocation20_spill] sm:$0xff] }
  0x76   :  { %2400 = vmatprep.subr.bf16.mxu1 %v2890_v22  ;;  %672 = vmatprep.mubr.f32.mxu1 %v3114_v18  ;;  %v2385_v42 = vpack.c.bf16 %v3030_v56, %v3019_v61  ;;  %v2387_v50 = vpack.c.bf16 %v3043_v2, %v3034_v10  ;;  %v2389_v60 = vpack.c.bf16 %v3060_v19, %v3049_v53  ;;  %v990_v28 = vand.u32 4294901760, %v955_v15  ;;  %v973_v43 = vld [vmem:[#allocation7 + $0x98] sm:$0xff]  ;;  %v956_v12 = vld [vmem:[#allocation7 + $0x10] sm:$0xff] }
  0x77   :  { %v2391_v5 = vpack.c.bf16 %v3073_v11, %v3064_v44  ;;  %v2393_v30 = vpack.c.bf16 %v3111_v54, %v3079_v8  ;;  %v3253_v46 = vsub.f32 %v970_v35, %v1035_v25  ;;  %v3255_v63 = vsub.f32 %v971_v13, %v1038_v26 }
  0x78   :  { %2378 = vmatpush3.bf16.msra.mxu0 %v2377_v33  ;;  %v957_v33 = vld [vmem:[#allocation7 + $0x18] sm:$0xff] }
  0x79   :  { %2402 = vmatpush3.bf16.msra.mxu1 %v2897_v27  ;;  %2380 = vmatprep.subr.bf16.mxu0 %v2379_v47 }
  0x7a   :  { %2404 = vmatprep.subr.bf16.mxu1 %v2911_v39 }
  0x7c   :  { %2382 = vmatpush3.bf16.msra.mxu0 %v2381_v3  ;;  %v3889_v3 = vand.u32 4294901760, %v3019_v61  ;;  %v3895_v61 = vand.u32 4294901760, %v3064_v44 }
  0x7d   :  { %2406 = vmatpush3.bf16.msra.mxu1 %v2919_v45  ;;  %2384 = vmatprep.subr.bf16.mxu0 %v2383_v17  ;;  %v3890_v17 = vand.u32 4294901760, %v3030_v56  ;;  %v3896_v56 = vand.u32 4294901760, %v3073_v11  ;;  %v3897_v11 = vand.u32 4294901760, %v3079_v8 }
  0x7e   :  { %2408 = vmatprep.subr.bf16.mxu1 %v2941_v62 }
  0x7f   :  { %v3288_v13 = vpack.c.bf16 %v3896_v56, %v3895_v61  ;;  %v961_v61 = vld [vmem:[#allocation7 + $0x38] sm:$0xff] }
  0x80   :  { %2386 = vmatpush3.bf16.msra.mxu0 %v2385_v42 }
  0x81   :  { %2410 = vmatpush3.bf16.msra.mxu1 %v2957_v16  ;;  %2388 = vmatprep.subr.bf16.mxu0 %v2387_v50  ;;  %v1044_v50 = vand.u32 4294901760, %v973_v43 }
  0x82   :  { %2412 = vmatprep.subr.bf16.mxu1 %v2972_v49 }
  0x84   :  { %2390 = vmatpush3.bf16.msra.mxu0 %v2389_v60  ;;  %v974_v60 = vld [vmem:[#allocation7 + $0xa0] sm:$0xff] }
  0x85   :  { %2414 = vmatpush3.bf16.msra.mxu1 %v2987_v4  ;;  %2392 = vmatprep.subr.bf16.mxu0 %v2391_v5  ;;  %v975_v5 = vld [vmem:[#allocation7 + $0xa8] sm:$0xff] }
  0x86   :  { %2416 = vmatprep.subr.bf16.mxu1 %v3880_v9 }
  0x88   :  { %2394 = vmatpush3.bf16.msra.mxu0 %v2393_v30 }
  0x89   :  { %2418 = vmatpush3.bf16.msra.mxu1 %v3881_v34  ;;  %2428 = vmatprep.subr.bf16.mxu0 %v2427_v1  ;;  %v987_v1 = vand.u32 4294901760, %v954_v32 }
  0x8a   :  { %2420 = vmatprep.subr.bf16.mxu1 %v3882_v52 }
  0x8b   :  { %568 = vmatmul.mubr.f32.vlgmr.msra.gmra.mrb[2].mxu0 %v3107_v0  ;;  %v983_v0 = vld [vmem:[#allocation7 + $0xe8] sm:$0xff] }
  0x8c   :  { %2430 = vmatpush3.bf16.msra.mxu0 %v2429_v59  ;;  %842 = vmatprep.mubr.f32.mxu0 %v3883_v6  ;;  %v972_v59 = vld [vmem:[#allocation7 + $0x90] sm:$0xff] }
  0x8d   :  { %2422 = vmatpush3.bf16.msra.mxu1 %v3884_v31  ;;  %2432 = vmatprep.subr.bf16.mxu0 %v2431_v57  ;;  %v3259_v57 = vsub.f32 %v954_v32, %v987_v1  ;;  %v1041_v42 = vand.u32 4294901760, %v972_v59  ;;  %v996_v32 = vand.u32 4294901760, %v957_v33 }
  0x8e   :  { %2424 = vmatprep.subr.bf16.mxu1 %v3885_v21 }
  0x8f   :  { %v3317_v8 = vsub.f32 %v957_v33, %v996_v32 }
  0x90   :  { %2434 = vmatpush3.bf16.msra.mxu0 %v2433_v41  ;;  %v3261_v41 = vsub.f32 %v955_v15, %v990_v28  ;;  %v958_v15 = vld [vmem:[#allocation7 + $0x20] sm:$0xff] }
  0x91   :  { %2426 = vmatpush3.bf16.msra.mxu1 %v3886_v38  ;;  %2436 = vmatprep.subr.bf16.mxu0 %v2435_v36  ;;  %v3888_v36 = vand.u32 4294901760, %v3013_v55  ;;  %v3894_v55 = vand.u32 4294901760, %v3060_v19  ;;  %v1050_v19 = vand.u32 4294901760, %v975_v5 }
  0x92   :  { %2460 = vmatprep.subr.bf16.mxu1 %v2882_v14  ;;  %v3887_v14 = vand.u32 4294901760, %v3004_v51  ;;  %v3893_v51 = vand.u32 4294901760, %v3049_v53  ;;  %v1047_v53 = vand.u32 4294901760, %v974_v60  ;;  %v3805_v44 = vand.u32 4294901760, %v3261_v41 }
  0x93   :  { %v3342_v56 = vsub.f32 %v975_v5, %v1050_v19 }
  0x94   :  { %676 = vmatmul.mubr.f32.vlgmr.msra.gmra.mrb[2].mxu1 %v3117_v29  ;;  %2438 = vmatpush3.bf16.msra.mxu0 %v3188_v23  ;;  %v2447_v47 = vpack.c.bf16 %v3888_v36, %v3887_v14  ;;  %v2449_v23 = vpack.c.bf16 %v3890_v17, %v3889_v3  ;;  %v3282_v35 = vpack.c.bf16 %v3894_v55, %v3893_v51  ;;  %v3806_v14 = vand.u32 4294901760, %v3259_v57 }
  0x95   :  { %2462 = vmatpush3.bf16.msra.mxu1 %v2886_v20  ;;  %2440 = vmatprep.subr.bf16.mxu0 %v3194_v24  ;;  %v3891_v20 = vand.u32 4294901760, %v3034_v10  ;;  %v3892_v24 = vand.u32 4294901760, %v3043_v2  ;;  %v3812_v10 = vand.u32 4294901760, %v3253_v46  ;;  %v3807_v2 = vand.u32 4294901760, %v3255_v63 }
  0x96   :  { %2464 = vmatprep.subr.bf16.mxu1 %v2890_v22  ;;  %946 = vmatprep.mubr.f32.mxu1 %v3883_v6  ;;  %v993_v22 = vand.u32 4294901760, %v956_v12  ;;  %v3898_v36 = vand.u32 4294901760, %v3111_v54  ;;  %v3304_v17 = vsub.f32 %v972_v59, %v1041_v42  ;;  %v3313_v51 = vpack.c.bf16 %v1044_v50, %v1041_v42 }
  0x97   :  { %v2451_v30 = vpack.c.bf16 %v3892_v24, %v3891_v20  ;;  %v3306_v20 = vsub.f32 %v973_v43, %v1044_v50  ;;  %v3311_v24 = vpack.c.bf16 %v990_v28, %v987_v1  ;;  %v1214_v54 = vsub.f32 %v3253_v46, %v3812_v10  ;;  %v960_v50 = vld [vmem:[#allocation7 + $0x30] sm:$0xff]  ;;  %v965_v10 = vld [vmem:[#allocation7 + $0x58] sm:$0xff] }
  0x98   :  { %2442 = vmatpush3.bf16.msra.mxu0 %v3200_v40  ;;  %v3302_v3 = vpack.c.bf16 %v3898_v36, %v3897_v11  ;;  %v3309_v40 = vpack.c.bf16 %v1038_v26, %v1035_v25  ;;  %v3315_v55 = vsub.f32 %v956_v12, %v993_v22  ;;  %v976_v25 = vld [vmem:[#allocation7 + $0xb0] sm:$0xff]  ;;  %v977_v26 = vld [vmem:[#allocation7 + $0xb8] sm:$0xff]  ;;  %v3326_v1 = vpack.c.bf16 %v996_v32, %v993_v22 }
  0x99   :  { %2466 = vmatpush3.bf16.msra.mxu1 %v2897_v27  ;;  %2444 = vmatprep.subr.bf16.mxu0 %v3206_v58  ;;  %v959_v27 = vld [vmem:[#allocation7 + $0x28] sm:$0xff]  ;;  %v999_v58 = vand.u32 4294901760, %v958_v15  ;;  %v3328_v28 = vpack.c.bf16 %v1050_v19, %v1047_v53  ;;  %v1102_v59 = vsub.f32 %v3259_v57, %v3806_v14  ;;  %v1109_v43 = vsub.f32 %v3261_v41, %v3805_v44  ;;  %v978_v19 = vld [vmem:[#allocation7 + $0xc0] sm:$0xff] }
  0x9a   :  { %2468 = vmatprep.subr.bf16.mxu1 %v2911_v39  ;;  %v1221_v39 = vsub.f32 %v3255_v63, %v3807_v2  ;;  %3899 = vst [vmem:[#allocation15_spill] sm:$0xff] %v3326_v1  ;;  %v3337_v12 = vsub.f32 %v974_v60, %v1047_v53  ;;  %v1002_v33 = vand.u32 4294901760, %v959_v27  ;;  %v3808_v42 = vand.u32 4294901760, %v3306_v20 }
  0x9b   :  { %3900 = vst [vmem:[#allocation16_spill] sm:$0xff] %v3328_v28  ;;  %v3344_v22 = vsub.f32 %v958_v15, %v999_v58  ;;  %v1053_v32 = vand.u32 4294901760, %v976_v25  ;;  %v1056_v11 = vand.u32 4294901760, %v977_v26  ;;  %v1215_v36 = vand.u32 4294901760, %v1214_v54 }
  0x9c   :  { %2446 = vmatpush3.bf16.msra.mxu0 %v3212_v48  ;;  %v3811_v48 = vand.u32 4294901760, %v3304_v17  ;;  %v3810_v60 = vand.u32 4294901760, %v3317_v8  ;;  %v1103_v53 = vand.u32 4294901760, %v1102_v59  ;;  %v1110_v44 = vand.u32 4294901760, %v1109_v43 }
  0x9d   :  { %2470 = vmatpush3.bf16.msra.mxu1 %v2919_v45  ;;  %2448 = vmatprep.subr.bf16.mxu0 %v2447_v47  ;;  %v1222_v45 = vand.u32 4294901760, %v1221_v39  ;;  %v3809_v47 = vand.u32 4294901760, %v3315_v55  ;;  %v1005_v14 = vand.u32 4294901760, %v960_v50  ;;  %v1008_v2 = vand.u32 4294901760, %v961_v61 }
  0x9e   :  { %2472 = vmatprep.subr.bf16.mxu1 %v2941_v62  ;;  %v3349_v62 = vsub.f32 %v959_v27, %v1002_v33  ;;  %v1228_v5 = vsub.f32 %v3304_v17, %v3811_v48  ;;  %v1235_v15 = vsub.f32 %v3306_v20, %v3808_v42  ;;  %v3360_v54 = vpack.c.bf16 %v1056_v11, %v1053_v32 }
  0x9f   :  { %v3364_v27 = vsub.f32 %v976_v25, %v1053_v32  ;;  %v3366_v39 = vsub.f32 %v977_v26, %v1056_v11  ;;  %v1116_v59 = vsub.f32 %v3315_v55, %v3809_v47  ;;  %v3375_v43 = vpack.c.bf16 %v1222_v45, %v1215_v36  ;;  %v962_v26 = vld [vmem:[#allocation7 + $0x40] sm:$0xff]  ;;  %v963_v47 = vld [vmem:[#allocation7 + $0x48] sm:$0xff] }
  0xa0   :  { %2450 = vmatpush3.bf16.msra.mxu0 %v2449_v23  ;;  %v3358_v23 = vpack.c.bf16 %v1002_v33, %v999_v58  ;;  %3902 = vst [vmem:[#allocation18_spill] sm:$0xff] %v3360_v54  ;;  %v979_v58 = vld [vmem:[#allocation7 + $0xc8] sm:$0xff]  ;;  %v3377_v33 = vpack.c.bf16 %v1110_v44, %v1103_v53  ;;  %v3379_v42 = vpack.c.bf16 %v1008_v2, %v1005_v14  ;;  %v1059_v25 = vand.u32 4294901760, %v978_v19 }
  0xa1   :  { %2474 = vmatpush3.bf16.msra.mxu1 %v2957_v16  ;;  %2452 = vmatprep.subr.bf16.mxu0 %v2451_v30  ;;  %v3813_v16 = vand.u32 4294901760, %v3337_v12  ;;  %v3814_v30 = vand.u32 4294901760, %v3342_v56  ;;  %v1229_v32 = vand.u32 4294901760, %v1228_v5  ;;  %v1236_v11 = vand.u32 4294901760, %v1235_v15 }
  0xa2   :  { %2476 = vmatprep.subr.bf16.mxu1 %v2972_v49  ;;  %3901 = vst [vmem:[#allocation17_spill] sm:$0xff] %v3358_v23  ;;  %v1123_v49 = vsub.f32 %v3317_v8, %v3810_v60  ;;  %3903 = vst [vmem:[#allocation19_spill] sm:$0xff] %v3379_v42  ;;  %v3815_v60 = vand.u32 4294901760, %v3344_v22  ;;  %v3816_v48 = vand.u32 4294901760, %v3349_v62  ;;  %v1062_v44 = vand.u32 4294901760, %v979_v58 }
  0xa3   :  { %v1242_v36 = vsub.f32 %v3337_v12, %v3813_v16  ;;  %v1117_v45 = vand.u32 4294901760, %v1116_v59  ;;  %v1011_v5 = vand.u32 4294901760, %v962_v26  ;;  %v3397_v15 = vsub.f32 %v978_v19, %v1059_v25  ;;  %v964_v16 = vld [vmem:[#allocation7 + $0x50] sm:$0xff] }
  0xa4   :  { %2454 = vmatpush3.bf16.msra.mxu0 %v3282_v35  ;;  %v3386_v35 = vsub.f32 %v960_v50, %v1005_v14  ;;  %v1124_v53 = vand.u32 4294901760, %v1123_v49  ;;  %v980_v14 = vld [vmem:[#allocation7 + $0xd0] sm:$0xff]  ;;  %v981_v50 = vld [vmem:[#allocation7 + $0xd8] sm:$0xff]  ;;  %v3412_v19 = vpack.c.bf16 %v1062_v44, %v1059_v25  ;;  %v3414_v59 = vsub.f32 %v979_v58, %v1062_v44 }
  0xa5   :  { %2478 = vmatpush3.bf16.msra.mxu1 %v2987_v4  ;;  %2456 = vmatprep.subr.bf16.mxu0 %v3288_v13  ;;  %v1249_v4 = vsub.f32 %v3342_v56, %v3814_v30  ;;  %v3394_v13 = vsub.f32 %v961_v61, %v1008_v2  ;;  %v3403_v2 = vpack.c.bf16 %v1236_v11, %v1229_v32  ;;  %v1243_v49 = vand.u32 4294901760, %v1242_v36 }
  0xa6   :  { %2480 = vmatprep.subr.bf16.mxu1 %v3880_v9  ;;  %v1014_v9 = vand.u32 4294901760, %v963_v47  ;;  %v1130_v61 = vsub.f32 %v3344_v22, %v3815_v60  ;;  %3904 = vst [vmem:[#allocation20_spill] sm:$0xff] %v3412_v19  ;;  %v3417_v32 = vpack.c.bf16 %v1124_v53, %v1117_v45  ;;  %v3419_v11 = vsub.f32 %v962_v26, %v1011_v5  ;;  %v982_v53 = vld [vmem:[#allocation7 + $0xe0] sm:$0xff] }
  0xa7   :  { %v1065_v30 = vand.u32 4294901760, %v980_v14  ;;  %v1068_v60 = vand.u32 4294901760, %v981_v50  ;;  %v3907_v25 = vand.u32 4294901760, %v3366_v39  ;;  %v1020_v29 = vand.u32 4294901760, %v965_v10 }
  0xa8   :  { %2458 = vmatpush3.bf16.msra.mxu0 %v3302_v3  ;;  %v1137_v3 = vsub.f32 %v3349_v62, %v3816_v48  ;;  %3905 = vst [vmem:[#allocation27_spill] sm:$0xff] %v3419_v11  ;;  %v3422_v48 = vpack.c.bf16 %v1014_v9, %v1011_v5  ;;  %v1131_v26 = vand.u32 4294901760, %v1130_v61  ;;  %v3820_v61 = vand.u32 4294901760, %v3397_v15 }
  0xa9   :  { %2482 = vmatpush3.bf16.msra.mxu1 %v3881_v34  ;;  %2492 = vmatprep.subr.bf16.mxu0 %v3309_v40  ;;  %v1250_v34 = vand.u32 4294901760, %v1249_v4  ;;  %v1263_v44 = vsub.f32 %v3366_v39, %v3907_v25  ;;  %v3819_v4 = vand.u32 4294901760, %v3386_v35  ;;  %v1017_v25 = vand.u32 4294901760, %v964_v16 }
  0xaa   :  { %2484 = vmatprep.subr.bf16.mxu1 %v3882_v52  ;;  %v3906_v52 = vand.u32 4294901760, %v3364_v27  ;;  %v1138_v36 = vand.u32 4294901760, %v1137_v3  ;;  %v3823_v3 = vand.u32 4294901760, %v3414_v59  ;;  %v3447_v45 = vsub.f32 %v981_v50, %v1068_v60 }
  0xab   :  { %844 = vmatmul.mubr.f32.vlgmr.msra.gmra.mrb[4].mxu0 %v3094_v37  ;;  %v3436_v5 = vpack.c.bf16 %v1250_v34, %v1243_v49  ;;  %v1264_v49 = vand.u32 4294901760, %v1263_v44  ;;  %v1071_v34 = vand.u32 4294901760, %v982_v53  ;;  %v3462_v50 = vsub.f32 %v964_v16, %v1017_v25  ;;  %v3466_v44 = vld [vmem:[#allocation7 + $0x60] sm:$0xff] }
  0xac   :  { %2494 = vmatpush3.bf16.msra.mxu0 %v3311_v24  ;;  %v1256_v58 = vsub.f32 %v3364_v27, %v3906_v52  ;;  %1087 = vmatprep.mubr.f32.mxu0 %v3133_v7  ;;  %v3438_v52 = vsub.f32 %v963_v47, %v1014_v9  ;;  %v3440_v7 = vpack.c.bf16 %v1068_v60, %v1065_v30  ;;  %v3911_v9 = vand.u32 4294901760, %v3394_v13 }
  0xad   :  { %2486 = vmatpush3.bf16.msra.mxu1 %v3884_v31  ;;  %2496 = vmatprep.subr.bf16.mxu0 %v3313_v51  ;;  %v3442_v31 = vsub.f32 %v980_v14, %v1065_v30  ;;  %3910 = vst [vmem:[#allocation30_spill] sm:$0xff] %v3447_v45  ;;  %v3451_v47 = vpack.c.bf16 %v1138_v36, %v1131_v26  ;;  %v3468_v26 = vld [vmem:[#allocation7 + $0x68] sm:$0xff]  ;;  %v3915_v18 = vand.u32 4294901760, %v3447_v45 }
  0xae   :  { %2488 = vmatprep.subr.bf16.mxu1 %v3885_v21  ;;  %3908 = vst [vmem:[#allocation28_spill] sm:$0xff] %v3438_v52  ;;  %v1257_v21 = vand.u32 4294901760, %v1256_v58  ;;  %v1144_v30 = vsub.f32 %v3386_v35, %v3819_v4  ;;  %v1151_v14 = vsub.f32 %v3394_v13, %v3911_v9  ;;  %v3460_v60 = vpack.c.bf16 %v1020_v29, %v1017_v25  ;;  %v3478_v25 = vld [vmem:[#allocation7 + $0xf0] sm:$0xff] }
  0xaf   :  { %3909 = vst [vmem:[#allocation29_spill] sm:$0xff] %v3442_v31  ;;  %v3464_v58 = vsub.f32 %v965_v10, %v1020_v29  ;;  %v1270_v36 = vsub.f32 %v3397_v15, %v3820_v61  ;;  %v1277_v9 = vsub.f32 %v3414_v59, %v3823_v3  ;;  %v3480_v29 = vld [vmem:[#allocation7 + $0xf8] sm:$0xff]  ;;  %v3484_v4 = vsub.f32 %v982_v53, %v1071_v34 }
  0xb0   :  { %2498 = vmatpush3.bf16.msra.mxu0 %v3326_v1  ;;  %v2535_v10 = vpack.c.bf16 %v1264_v49, %v1257_v21  ;;  %v1145_v3 = vand.u32 4294901760, %v1144_v30  ;;  %v1152_v16 = vand.u32 4294901760, %v1151_v14  ;;  %v1026_v1 = vand.u32 4294901760, %v3468_v26 }
  0xb1   :  { %2490 = vmatpush3.bf16.msra.mxu1 %v3886_v38  ;;  %2500 = vmatprep.subr.bf16.mxu0 %v3328_v28  ;;  %v1074_v38 = vand.u32 4294901760, %v983_v0  ;;  %v1077_v21 = vand.u32 4294901760, %v3478_v25  ;;  %v1080_v49 = vand.u32 4294901760, %v3480_v29  ;;  %v3499_v28 = vld [vmem:[#allocation7 + $0x70] sm:$0xff]  ;;  %v1271_v30 = vand.u32 4294901760, %v1270_v36 }
  0xb2   :  { %2524 = vmatprep.subr.bf16.mxu1 %v3375_v43  ;;  %v1023_v43 = vand.u32 4294901760, %v3466_v44  ;;  %v1278_v14 = vand.u32 4294901760, %v1277_v9  ;;  %v3912_v61 = vand.u32 4294901760, %v3419_v11 }
  0xb3   :  { %v3495_v53 = vsub.f32 %v983_v0, %v1074_v38  ;;  %v3531_v9 = vsub.f32 %v3480_v29, %v1080_v49 }
  0xb4   :  { %948 = vmatmul.mubr.f32.vlgmr.msra.gmra.mrb[4].mxu1 %v3094_v37  ;;  %2502 = vmatpush3.bf16.msra.mxu0 %v3358_v23  ;;  %v3493_v23 = vpack.c.bf16 %v1074_v38, %v1071_v34  ;;  %v3914_v34 = vand.u32 4294901760, %v3442_v31 }
  0xb5   :  { %2526 = vmatpush3.bf16.msra.mxu1 %v3377_v33  ;;  %2504 = vmatprep.subr.bf16.mxu0 %v3360_v54  ;;  %v969_v33 = vld [vmem:[#allocation7 + $0x78] sm:$0xff]  ;;  %v1158_v54 = vsub.f32 %v3419_v11, %v3912_v61  ;;  %v3520_v61 = vsub.f32 %v3466_v44, %v1023_v43  ;;  %v3844_v36 = vand.u32 4294901760, %v3495_v53  ;;  %v2537_v44 = vpack.c.bf16 %v1152_v16, %v1145_v3 }
  0xb6   :  { %2528 = vmatprep.subr.bf16.mxu1 %v3403_v2  ;;  %1323 = vmatprep.mubr.f32.mxu1 %v3883_v6  ;;  %v3913_v2 = vand.u32 4294901760, %v3438_v52  ;;  %v1284_v38 = vsub.f32 %v3442_v31, %v3914_v34  ;;  %v1291_v6 = vsub.f32 %v3447_v45, %v3915_v18  ;;  %v1029_v34 = vand.u32 4294901760, %v3499_v28 }
  0xb7   :  { %v3528_v18 = vsub.f32 %v3478_v25, %v1077_v21  ;;  %v1159_v45 = vand.u32 4294901760, %v1158_v54  ;;  %v3917_v11 = vand.u32 4294901760, %v3464_v58  ;;  %v1185_v16 = vand.u32 4294901760, %v3520_v61 }
  0xb8   :  { %v1165_v0 = vsub.f32 %v3438_v52, %v3913_v2  ;;  %2506 = vmatpush3.bf16.msra.mxu0 %v3379_v42  ;;  %v3523_v2 = vsub.f32 %v3468_v26, %v1026_v1  ;;  %v1032_v42 = vand.u32 4294901760, %v969_v33  ;;  %v1285_v31 = vand.u32 4294901760, %v1284_v38 }
  0xb9   :  { %2530 = vmatpush3.bf16.msra.mxu1 %v3417_v32  ;;  %2508 = vmatprep.subr.bf16.mxu0 %v3412_v19  ;;  %v1297_v32 = vand.u32 4294901760, %v3484_v4  ;;  %v2539_v19 = vpack.c.bf16 %v1278_v14, %v1271_v30  ;;  %v1292_v52 = vand.u32 4294901760, %v1291_v6  ;;  %v1179_v29 = vsub.f32 %v3464_v58, %v3917_v11 }
  0xba   :  { %2532 = vmatprep.subr.bf16.mxu1 %v3436_v5  ;;  %v1166_v26 = vand.u32 4294901760, %v1165_v0  ;;  %v3916_v5 = vand.u32 4294901760, %v3462_v50  ;;  %v3545_v3 = vsub.f32 %v3499_v28, %v1029_v34  ;;  %v3547_v54 = vsub.f32 %v969_v33, %v1032_v42 }
  0xbb   :  { %v1192_v6 = vand.u32 4294901760, %v3523_v2  ;;  %v1298_v30 = vsub.f32 %v3484_v4, %v1297_v32  ;;  %v1305_v11 = vsub.f32 %v3495_v53, %v3844_v36  ;;  %v3846_v28 = vand.u32 4294901760, %v3531_v9 }
  0xbc   :  { %2510 = vmatpush3.bf16.msra.mxu0 %v3422_v48  ;;  %v1172_v25 = vsub.f32 %v3462_v50, %v3916_v5  ;;  %v3559_v14 = vpack.c.bf16 %v1026_v1, %v1023_v43  ;;  %v3561_v33 = vpack.c.bf16 %v1080_v49, %v1077_v21  ;;  %v2541_v0 = vpack.c.bf16 %v1166_v26, %v1159_v45 }
  0xbd   :  { %2534 = vmatpush3.bf16.msra.mxu1 %v3451_v47  ;;  %2512 = vmatprep.subr.bf16.mxu0 %v3440_v7  ;;  %v1311_v47 = vand.u32 4294901760, %v3528_v18  ;;  %v1180_v5 = vand.u32 4294901760, %v1179_v29  ;;  %v1186_v36 = vsub.f32 %v3520_v61, %v1185_v16  ;;  %v1193_v1 = vsub.f32 %v3523_v2, %v1192_v6 }
  0xbe   :  { %2536 = vmatprep.subr.bf16.mxu1 %v2535_v10  ;;  %v2543_v10 = vpack.c.bf16 %v1292_v52, %v1285_v31  ;;  %v1173_v38 = vand.u32 4294901760, %v1172_v25  ;;  %v3845_v43 = vand.u32 4294901760, %v3545_v3  ;;  %v3847_v21 = vand.u32 4294901760, %v3547_v54 }
  0xbf   :  { %v1299_v45 = vand.u32 4294901760, %v1298_v30  ;;  %v1306_v52 = vand.u32 4294901760, %v1305_v11  ;;  %v1312_v31 = vsub.f32 %v3528_v18, %v1311_v47  ;;  %v1319_v49 = vsub.f32 %v3531_v9, %v3846_v28 }
  0xc0   :  { %2514 = vmatpush3.bf16.msra.mxu0 %v3460_v60  ;;  %v2545_v26 = vpack.c.bf16 %v1180_v5, %v1173_v38  ;;  %v2555_v25 = vpack.c.bf16 %v3255_v63, %v3253_v46  ;;  %v1194_v29 = vand.u32 4294901760, %v1193_v1  ;;  %v1200_v30 = vsub.f32 %v3545_v3, %v3845_v43 }
  0xc1   :  { %2538 = vmatpush3.bf16.msra.mxu1 %v2537_v44  ;;  %2516 = vmatprep.subr.bf16.mxu0 %v3493_v23  ;;  %v3580_v44 = vpack.c.bf16 %v1032_v42, %v1029_v34  ;;  %v1207_v11 = vsub.f32 %v3547_v54, %v3847_v21  ;;  %v2547_v42 = vpack.c.bf16 %v1306_v52, %v1299_v45  ;;  %v1313_v34 = vand.u32 4294901760, %v1312_v31  ;;  %v3918_v21 = vld [vmem:[#allocation26_spill] sm:$0xff] }
  0xc2   :  { %2540 = vmatprep.subr.bf16.mxu1 %v2539_v19  ;;  %v1187_v19 = vand.u32 4294901760, %v1186_v36  ;;  %v1320_v38 = vand.u32 4294901760, %v1319_v49  ;;  %v2559_v5 = vpack.c.bf16 %v3306_v20, %v3304_v17  ;;  %v1201_v1 = vand.u32 4294901760, %v1200_v30  ;;  %v3919_v45 = vld [vmem:[#allocation22_spill] sm:$0xff]  ;;  %v3923_v30 = vld [vmem:[#allocation15_spill] sm:$0xff] }
  0xc3   :  { %v1208_v43 = vand.u32 4294901760, %v1207_v11  ;;  %v2563_v31 = vpack.c.bf16 %v3342_v56, %v3337_v12  ;;  %v2565_v49 = vpack.c.bf16 %v3349_v62, %v3344_v22  ;;  %v3924_v11 = vld [vmem:[#allocation29_spill] sm:$0xff] }
  0xc4   :  { %2518 = vmatpush3.bf16.msra.mxu0 %v3559_v14  ;;  %v2549_v36 = vpack.c.bf16 %v1194_v29, %v1187_v19  ;;  %v2551_v28 = vpack.c.bf16 %v1320_v38, %v1313_v34  ;;  %v3922_v19 = vld [vmem:[#allocation28_spill] sm:$0xff] }
  0xc5   :  { %2542 = vmatpush3.bf16.msra.mxu1 %v2541_v0  ;;  %2520 = vmatprep.subr.bf16.mxu0 %v3561_v33  ;;  %v2557_v0 = vpack.c.bf16 %v3261_v41, %v3259_v57  ;;  %v2553_v52 = vpack.c.bf16 %v1208_v43, %v1201_v1  ;;  %v2569_v43 = vpack.c.bf16 %v3394_v13, %v3386_v35  ;;  %v3926_v38 = vld [vmem:[#allocation16_spill] sm:$0xff]  ;;  %v3928_v1 = vld [vmem:[#allocation18_spill] sm:$0xff] }
  0xc6   :  { %2544 = vmatprep.subr.bf16.mxu1 %v2543_v10  ;;  %v2561_v10 = vpack.c.bf16 %v3317_v8, %v3315_v55 }
  0xc8   :  { %2522 = vmatpush3.bf16.msra.mxu0 %v3580_v44 }
  0xc9   :  { %2546 = vmatpush3.bf16.msra.mxu1 %v2545_v26  ;;  %2556 = vmatprep.subr.bf16.mxu0 %v2555_v25  ;;  %v3920_v26 = vld [vmem:[#allocation24_spill] sm:$0xff]  ;;  %v3921_v25 = vld [vmem:[#allocation27_spill] sm:$0xff] }
  0xca   :  { %2548 = vmatprep.subr.bf16.mxu1 %v2547_v42  ;;  %v2573_v29 = vpack.c.bf16 %v3922_v19, %v3921_v25  ;;  %v3925_v42 = vld [vmem:[#allocation30_spill] sm:$0xff] }
  0xcb   :  { %1093 = vmatmul.mubr.f32.vlgmr.msra.gmra.mrb[6].mxu0 %v3918_v21  ;;  %v2567_v21 = vpack.c.bf16 %v3366_v39, %v3364_v27  ;;  %v2575_v34 = vpack.c.bf16 %v3925_v42, %v3924_v11 }
  0xcc   :  { %2558 = vmatpush3.bf16.msra.mxu0 %v2557_v0  ;;  %1460 = vmatprep.mubr.f32.mxu0 %v3919_v45  ;;  %v2577_v0 = vpack.c.bf16 %v3464_v58, %v3462_v50  ;;  %v3929_v45 = vld [vmem:[#allocation19_spill] sm:$0xff] }
  0xcd   :  { %2550 = vmatpush3.bf16.msra.mxu1 %v2549_v36  ;;  %2560 = vmatprep.subr.bf16.mxu0 %v2559_v5  ;;  %v3927_v36 = vld [vmem:[#allocation17_spill] sm:$0xff]  ;;  %v2579_v5 = vpack.c.bf16 %v3495_v53, %v3484_v4  ;;  %v3960_v4 = vand.u32 4294901760, %v3545_v3 }
  0xce   :  { %2552 = vmatprep.subr.bf16.mxu1 %v2551_v28  ;;  %v2571_v28 = vpack.c.bf16 %v3414_v59, %v3397_v15 }
  0xd0   :  { %2562 = vmatpush3.bf16.msra.mxu0 %v2561_v10  ;;  %v2581_v10 = vpack.c.bf16 %v3523_v2, %v3520_v61 }
  0xd1   :  { %2554 = vmatpush3.bf16.msra.mxu1 %v2553_v52  ;;  %2564 = vmatprep.subr.bf16.mxu0 %v2563_v31  ;;  %v2583_v52 = vpack.c.bf16 %v3531_v9, %v3528_v18  ;;  %v3930_v31 = vld [vmem:[#allocation20_spill] sm:$0xff] }
  0xd2   :  { %2588 = vmatprep.subr.bf16.mxu1 %v3309_v40 }
  0xd4   :  { %1325 = vmatmul.mubr.f32.vlgmr.msra.gmra.mrb[6].mxu1 %v3094_v37  ;;  %2566 = vmatpush3.bf16.msra.mxu0 %v2565_v49  ;;  %v2585_v49 = vpack.c.bf16 %v3547_v54, %v3545_v3 }
  0xd5   :  { %2590 = vmatpush3.bf16.msra.mxu1 %v3311_v24  ;;  %2568 = vmatprep.subr.bf16.mxu0 %v2567_v21  ;;  %v3931_v21 = vand.u32 4294901760, %v3253_v46  ;;  %v3937_v46 = vld [vmem:[#allocation23_spill] sm:$0xff] }
  0xd6   :  { %2592 = vmatprep.subr.bf16.mxu1 %v3313_v51  ;;  %1567 = vmatprep.mubr.f32.mxu1 %v3920_v26  ;;  %v3933_v26 = vand.u32 4294901760, %v3259_v57  ;;  %v3939_v57 = vand.u32 4294901760, %v3317_v8  ;;  %v3945_v8 = vand.u32 4294901760, %v3364_v27  ;;  %v3951_v27 = vand.u32 4294901760, %v3414_v59 }
  0xd7   :  { %v3957_v59 = vand.u32 4294901760, %v3464_v58 }
  0xd8   :  { %2570 = vmatpush3.bf16.msra.mxu0 %v2569_v43  ;;  %v3932_v43 = vand.u32 4294901760, %v3255_v63  ;;  %v3938_v63 = vand.u32 4294901760, %v3315_v55  ;;  %v3944_v55 = vand.u32 4294901760, %v3349_v62  ;;  %v3950_v62 = vand.u32 4294901760, %v3397_v15 }
  0xd9   :  { %2594 = vmatpush3.bf16.msra.mxu1 %v3923_v30  ;;  %2572 = vmatprep.subr.bf16.mxu0 %v2571_v28 }
  0xda   :  { %2596 = vmatprep.subr.bf16.mxu1 %v3926_v38  ;;  %v2619_v28 = vpack.c.bf16 %v3932_v43, %v3931_v21  ;;  %v3943_v21 = vand.u32 4294901760, %v3344_v22  ;;  %v3949_v22 = vand.u32 4294901760, %v3394_v13  ;;  %v3955_v13 = vand.u32 4294901760, %v3925_v42 }
  0xdc   :  { %2574 = vmatpush3.bf16.msra.mxu0 %v2573_v29  ;;  %v3934_v29 = vand.u32 4294901760, %v3261_v41  ;;  %v3940_v41 = vld [vmem:[#allocation21_spill] sm:$0xff]  ;;  %v2629_v43 = vpack.c.bf16 %v3944_v55, %v3943_v21 }
  0xdd   :  { %2598 = vmatpush3.bf16.msra.mxu1 %v3927_v36  ;;  %2576 = vmatprep.subr.bf16.mxu0 %v2575_v34 }
  0xde   :  { %2600 = vmatprep.subr.bf16.mxu1 %v3928_v1  ;;  %v2621_v34 = vpack.c.bf16 %v3934_v29, %v3933_v26 }
  0xe0   :  { %2578 = vmatpush3.bf16.msra.mxu0 %v2577_v0  ;;  %v3935_v0 = vand.u32 4294901760, %v3304_v17  ;;  %v3941_v17 = vand.u32 4294901760, %v3337_v12  ;;  %v3947_v12 = vld [vmem:[#allocation25_spill] sm:$0xff] }
  0xe1   :  { %2602 = vmatpush3.bf16.msra.mxu1 %v3929_v45  ;;  %2580 = vmatprep.subr.bf16.mxu0 %v2579_v5  ;;  %v3936_v5 = vand.u32 4294901760, %v3306_v20  ;;  %v3942_v20 = vand.u32 4294901760, %v3342_v56  ;;  %v3948_v56 = vand.u32 4294901760, %v3386_v35 }
  0xe2   :  { %2604 = vmatprep.subr.bf16.mxu1 %v3930_v31 }
  0xe3   :  { %v2633_v29 = vpack.c.bf16 %v3949_v22, %v3948_v56 }
  0xe4   :  { %2582 = vmatpush3.bf16.msra.mxu0 %v2581_v10  ;;  %v2623_v10 = vpack.c.bf16 %v3936_v5, %v3935_v0 }
  0xe5   :  { %2606 = vmatpush3.bf16.msra.mxu1 %v3422_v48  ;;  %2584 = vmatprep.subr.bf16.mxu0 %v2583_v52  ;;  %v2625_v52 = vpack.c.bf16 %v3939_v57, %v3938_v63 }
  0xe6   :  { %2608 = vmatprep.subr.bf16.mxu1 %v3440_v7 }
  0xe8   :  { %2586 = vmatpush3.bf16.msra.mxu0 %v2585_v49  ;;  %v2627_v49 = vpack.c.bf16 %v3942_v20, %v3941_v17 }
  0xe9   :  { %2610 = vmatpush3.bf16.msra.mxu1 %v3460_v60  ;;  %2620 = vmatprep.subr.bf16.mxu0 %v2619_v28  ;;  %v3946_v28 = vand.u32 4294901760, %v3366_v39  ;;  %v3953_v39 = vand.u32 4294901760, %v3922_v19 }
  0xea   :  { %2612 = vmatprep.subr.bf16.mxu1 %v3493_v23 }
  0xeb   :  { %1463 = vmatmul.mubr.f32.vlgmr.msra.gmra.mrb[8].mxu0 %v3937_v46  ;;  %v2631_v26 = vpack.c.bf16 %v3946_v28, %v3945_v8 }
  0xec   :  { %2622 = vmatpush3.bf16.msra.mxu0 %v2621_v34  ;;  %1737 = vmatprep.mubr.f32.mxu0 %v3940_v41  ;;  %v2635_v34 = vpack.c.bf16 %v3951_v27, %v3950_v62 }
  0xed   :  { %2614 = vmatpush3.bf16.msra.mxu1 %v3559_v14  ;;  %2624 = vmatprep.subr.bf16.mxu0 %v2623_v10 }
  0xee   :  { %2616 = vmatprep.subr.bf16.mxu1 %v3561_v33 }
  0xf0   :  { %2626 = vmatpush3.bf16.msra.mxu0 %v2625_v52 }
  0xf1   :  { %2618 = vmatpush3.bf16.msra.mxu1 %v3580_v44  ;;  %2628 = vmatprep.subr.bf16.mxu0 %v2627_v49 }
  0xf2   :  { %2652 = vmatprep.subr.bf16.mxu1 %v3309_v40  ;;  %v3952_v40 = vand.u32 4294901760, %v3921_v25  ;;  %v3958_v25 = vand.u32 4294901760, %v3495_v53  ;;  %v3961_v53 = vand.u32 4294901760, %v3547_v54 }
  0xf4   :  { %1571 = vmatmul.mubr.f32.vlgmr.msra.gmra.mrb[8].mxu1 %v3947_v12  ;;  %2630 = vmatpush3.bf16.msra.mxu0 %v2629_v43  ;;  %v2637_v35 = vpack.c.bf16 %v3953_v39, %v3952_v40  ;;  %v2643_v19 = vpack.c.bf16 %v3958_v25, %v1297_v32  ;;  %v2649_v32 = vpack.c.bf16 %v3961_v53, %v3960_v4 }
  0xf5   :  { %2654 = vmatpush3.bf16.msra.mxu1 %v3311_v24  ;;  %2632 = vmatprep.subr.bf16.mxu0 %v2631_v26  ;;  %v3954_v24 = vand.u32 4294901760, %v3924_v11 }
  0xf6   :  { %2656 = vmatprep.subr.bf16.mxu1 %v3313_v51  ;;  %1841 = vmatprep.mubr.f32.mxu1 %v3940_v41  ;;  %v3956_v51 = vand.u32 4294901760, %v3462_v50  ;;  %v3959_v50 = vand.u32 4294901760, %v3531_v9 }
  0xf7   :  { %v2639_v15 = vpack.c.bf16 %v3955_v13, %v3954_v24 }
  0xf8   :  { %2634 = vmatpush3.bf16.msra.mxu0 %v2633_v29  ;;  %v2641_v0 = vpack.c.bf16 %v3957_v59, %v3956_v51  ;;  %v2647_v58 = vpack.c.bf16 %v3959_v50, %v1311_v47 }
  0xf9   :  { %2658 = vmatpush3.bf16.msra.mxu1 %v3923_v30  ;;  %2636 = vmatprep.subr.bf16.mxu0 %v2635_v34  ;;  %v2645_v30 = vpack.c.bf16 %v1192_v6, %v1185_v16 }
  0xfa   :  { %2660 = vmatprep.subr.bf16.mxu1 %v3926_v38 }
  0xfc   :  { %2638 = vmatpush3.bf16.msra.mxu0 %v2637_v35 }
  0xfd   :  { %2662 = vmatpush3.bf16.msra.mxu1 %v3927_v36  ;;  %2640 = vmatprep.subr.bf16.mxu0 %v2639_v15 }
  0xfe   :  { %2664 = vmatprep.subr.bf16.mxu1 %v3928_v1 }
 0x100   :  { %2642 = vmatpush3.bf16.msra.mxu0 %v2641_v0 }
 0x101   :  { %2666 = vmatpush3.bf16.msra.mxu1 %v3929_v45  ;;  %2644 = vmatprep.subr.bf16.mxu0 %v2643_v19 }
 0x102   :  { %2668 = vmatprep.subr.bf16.mxu1 %v3930_v31 }
 0x104   :  { %2646 = vmatpush3.bf16.msra.mxu0 %v2645_v30 }
 0x105   :  { %2670 = vmatpush3.bf16.msra.mxu1 %v3422_v48  ;;  %2648 = vmatprep.subr.bf16.mxu0 %v2647_v58 }
 0x106   :  { %2672 = vmatprep.subr.bf16.mxu1 %v3440_v7 }
 0x108   :  { %2650 = vmatpush3.bf16.msra.mxu0 %v2649_v32 }
 0x109   :  { %2674 = vmatpush3.bf16.msra.mxu1 %v3460_v60 }
 0x10a   :  { %2676 = vmatprep.subr.bf16.mxu1 %v3493_v23 }
 0x10b   :  { %1739 = vmatmul.mubr.f32.vlgmr.msra.gmra.mrb[10].mxu0 %v3094_v37 }
 0x10d   :  { %2678 = vmatpush3.bf16.msra.mxu1 %v3559_v14 }
 0x10e   :  { %2680 = vmatprep.subr.bf16.mxu1 %v3561_v33 }
 0x111   :  { %2682 = vmatpush3.bf16.msra.mxu1 %v3580_v44 }
 0x114   :  { %1843 = vmatmul.mubr.f32.vlgmr.msra.gmra.mrb[10].mxu1 %v3094_v37 }
 0x13e   :  { %v1911_v9 = vpop.f32.mrb[0].mxu0 }
 0x13f   :  { %v1912_v48 = vpop.f32.mrb[1].mxu0 }
 0x140   :  { %v1913_v61 = vadd.f32 %v1912_v48, %v1911_v9 }
 0x147   :  { %v1946_v2 = vpop.f32.mrb[0].mxu1 }
 0x148   :  { %v1947_v7 = vpop.f32.mrb[1].mxu1 }
 0x149   :  { %v1948_v18 = vadd.f32 %v1947_v7, %v1946_v2 }
 0x14b   :  { %v432_v3 = vadd.f32 %v1948_v18, %v1913_v61 }
 0x15e   :  { %v1981_v60 = vpop.f32.mrb[2].mxu0 }
 0x15f   :  { %v1982_v54 = vpop.f32.mrb[3].mxu0 }
 0x160   :  { %v1983_v23 = vadd.f32 %v1982_v54, %v1981_v60 }
 0x162   :  { %v570_v16 = vadd.f32 %v1983_v23, %v432_v3 }
 0x167   :  { %v2016_v6 = vpop.f32.mrb[2].mxu1 }
 0x168   :  { %v2017_v47 = vpop.f32.mrb[3].mxu1 }
 0x169   :  { %v2018_v14 = vadd.f32 %v2017_v47, %v2016_v6 }
 0x16b   :  { %v678_v11 = vadd.f32 %v2018_v14, %v570_v16 }
 0x17e   :  { %v2051_v33 = vpop.f32.mrb[4].mxu0 }
 0x17f   :  { %v2052_v42 = vpop.f32.mrb[5].mxu0 }
 0x180   :  { %v2053_v44 = vadd.f32 %v2052_v42, %v2051_v33 }
 0x182   :  { %v846_v38 = vadd.f32 %v2053_v44, %v678_v11 }
 0x187   :  { %v2086_v37 = vpop.f32.mrb[4].mxu1 }
 0x188   :  { %v2087_v36 = vpop.f32.mrb[5].mxu1 }
 0x189   :  { %v2088_v1 = vadd.f32 %v2087_v36, %v2086_v37 }
 0x18b   :  { %v950_v45 = vadd.f32 %v2088_v1, %v846_v38 }
 0x18d   :  { %953 = vst [vmem:[#allocation8] sm:$0xff] %v950_v45 }
 0x18e   :  { %2767 = shalt.err (!%p2764_p0)
}
 0x18f   :  { %s2768_s29 = scalar_lea.hbm %s3755_s3, 128 }
 0x190   :  { %p2769_p1 = scmp.ne.s32.totalorder %s3755_s3, %s2768_s29  ;;  %p2772_p2 = scmp.lt.u32.totalorder %s2768_s29, %s3755_s3 }
 0x192   :  { %p2774_p3 = pnand %p2772_p2, %p2769_p1 }
 0x194   :  { %2777 = shalt.err (!%p2774_p3)
}
 0x195   :  { %1858 = dma.vmem_to_hbm [thread:$0]  %s1856_s25, 128, %s3755_s3, [#allocation4]  }
 0x196   :  { %s2814_s3 = smov [#allocation9]  }
 0x197   :  { %s1865_s10 = sshll.u32 %s2814_s3, 4  ;;  %s1866_s10 = int_to_ptr.vmem [resolvable:$true] %s1865_s10 }
 0x198   :  { %s2778_s11 = scalar_lea.vmem %s1866_s10, 128  ;;  %p2783_p5 = scmp.lt.s32.totalorder %s1866_s10, %s1866_s10 }
 0x199   :  { %p2779_p4 = scmp.ne.s32.totalorder %s1866_s10, %s2778_s11  ;;  %p2784_p6 = scmp.lt.s32.totalorder %s2778_s11, %s2778_s11 }
 0x19b   :  { %p2785_p7 = por %p2784_p6, %p2783_p5 }
 0x19d   :  { %p2786_p8 = pnand %p2785_p7, %p2779_p4 }
 0x19e   :  { %v2121_v31 = vpop.f32.mrb[6].mxu0 }
 0x19f   :  { %v2122_v5 = vpop.f32.mrb[7].mxu0 }
 0x1a0   :  { %v2123_v10 = vadd.f32 %v2122_v5, %v2121_v31 }
 0x1a7   :  { %v2156_v46 = vpop.f32.mrb[6].mxu1 }
 0x1a8   :  { %v2157_v63 = vpop.f32.mrb[7].mxu1 }
 0x1a9   :  { %v2158_v57 = vadd.f32 %v2157_v63, %v2156_v46 }
 0x1ab   :  { %v1327_v52 = vadd.f32 %v2158_v57, %v2123_v10 }
 0x1be   :  { %v2191_v41 = vpop.f32.mrb[8].mxu0 }
 0x1bf   :  { %v2192_v17 = vpop.f32.mrb[9].mxu0 }
 0x1c0   :  { %v2193_v20 = vadd.f32 %v2192_v17, %v2191_v41 }
 0x1c2   :  { %v1465_v49 = vadd.f32 %v2193_v20, %v1327_v52 }
 0x1c7   :  { %v2226_v21 = vpop.f32.mrb[8].mxu1 }
 0x1c8   :  { %v2227_v55 = vpop.f32.mrb[9].mxu1 }
 0x1c9   :  { %v2228_v43 = vadd.f32 %v2227_v55, %v2226_v21 }
 0x1cb   :  { %v1573_v8 = vadd.f32 %v2228_v43, %v1465_v49 }
 0x1de   :  { %v2261_v28 = vpop.f32.mrb[10].mxu0 }
 0x1df   :  { %v2262_v26 = vpop.f32.mrb[11].mxu0 }
 0x1e0   :  { %v2263_v12 = vadd.f32 %v2262_v26, %v2261_v28 }
 0x1e2   :  { %v1741_v56 = vadd.f32 %v2263_v12, %v1573_v8 }
 0x1e7   :  { %v2296_v22 = vpop.f32.mrb[10].mxu1 }
 0x1e8   :  { %v2297_v29 = vpop.f32.mrb[11].mxu1 }
 0x1e9   :  { %v2298_v62 = vadd.f32 %v2297_v29, %v2296_v22 }
 0x1eb   :  { %v1845_v27 = vadd.f32 %v2298_v62, %v1741_v56 }
 0x1ed   :  { %1848 = vst [vmem:[#allocation9] sm:$0xff] %v1845_v27 }
 0x1ee   :  { %2789 = shalt.err (!%p2786_p8)
}
 0x1ef   :  { %s2790_s1 = scalar_lea.hbm %s3756_s4, 128 }
 0x1f0   :  { %p2791_p9 = scmp.ne.s32.totalorder %s3756_s4, %s2790_s1  ;;  %p2794_p10 = scmp.lt.u32.totalorder %s2790_s1, %s3756_s4 }
 0x1f2   :  { %p2796_p11 = pnand %p2794_p10, %p2791_p9 }
 0x1f4   :  { %2799 = shalt.err (!%p2796_p11)
}
 0x1f5   :  { %1868 = dma.vmem_to_hbm [thread:$0]  %s1866_s10, 128, %s3756_s4, [#allocation10]  }
 0x1f6   :  { %2804 = dma.done.wait [#allocation4], 128  }
 0x1f7   :  { %2805 = vsyncadd [#allocation4], 4294967168 }
 0x1f8   :  { %2806 = dma.done.wait [#allocation10], 128  }
 0x1f9   :  { %2807 = vsyncadd [#allocation10], 4294967168 }
 0x1fa   :  { %1875 = vsyncpa [#allocation3], 1 }
 0x1fb   :  { %1876 = vsyncpa [#allocation6], 1 }
 0x1fc   :  { %1877 = vsyncpa [#allocation4], 1 }
 0x1fd   :  { %1878 = vsyncpa [#allocation10], 1 }

</bundles_post_ra>
